<compile_context>
chip_gen: v5e
topology: v5e:2x2
jax: 0.10.0
libtpu: 0.0.40
codegen_flags: <defaults>
</compile_context>

<pallas_src>
import functools
import math

import jax
import jax.numpy as jnp
from jax import lax
from jax.experimental import pallas as pl
from jax.experimental.pallas import tpu as pltpu

EPS = 1e-6          # SoftNorm eps
BN_EPS = 1e-5       # nn.BatchNorm2d default eps
V_HALF = 3 // 2     # v_size = 3  -> vertical ones(3) conv, padding 1
K_RADIUS = 7 // 2   # max_pool2d kernel_size=7, stride=1, padding=3 along H


# ----------------------------------------------------------------------------
# Fused SoftNorm kernel: one grid step = one batch element, data laid out (C, H*W)
# ----------------------------------------------------------------------------
def _soft_norm_kernel(x_ref, o_ref, *, p, eps, bn_scale, bn_shift, H, W):
    HW = H * W
    x = x_ref[0].astype(jnp.float32)                     # (C, HW)

    # ---- GeM-style channel norm: clamp ^ p, sum over C, ^ (1/p) ----
    fc = jnp.maximum(x, eps)
    if p == 3.0:
        fp = fc * fc * fc                                # 2 VPU muls, not exp/log pow (EUP)
    else:
        fp = fc ** p
    norm = jnp.sum(fp, axis=0, keepdims=True) ** (1.0 / p)      # (1, HW), root only on small map

    # ---- generate_mask_v0 (eval branch) ----
    # row score rs[h] = sum_w norm[h-1,w] + norm[h,w] + norm[h+1,w]  (zero-padded at edges)
    #                 = sum of norm over flat positions whose row is in [h-1, h+1].
    jj = lax.broadcasted_iota(jnp.int32, (H, HW), 1)             # flat position
    hh = lax.broadcasted_iota(jnp.int32, (H, HW), 0)             # target stripe row
    in_band = (jj >= (hh - V_HALF) * W) & (jj < (hh + V_HALF + 1) * W)
    rs = jnp.sum(jnp.where(in_band, norm, 0.0), axis=1, keepdims=True)   # (H, 1)

    # first argmax over H (torch.argmax tie-break = first maximal index)
    rmax = jnp.max(rs, axis=(0, 1), keepdims=True)               # (1, 1)
    hio = lax.broadcasted_iota(jnp.int32, (H, 1), 0)
    best_h = jnp.min(jnp.where(rs >= rmax, hio, H),
                     axis=(0, 1), keepdims=True)                 # (1, 1) int32

    # max_pool(k=7, stride=1, pad=3) dilation of the one-hot == rows within K_RADIUS of best_h
    j = lax.broadcasted_iota(jnp.int32, (1, HW), 1)
    mask = (j >= (best_h - K_RADIUS) * W) & (j < (best_h + K_RADIUS + 1) * W)   # (1, HW)

    # ---- BatchNorm2d(1) (eval, folded to scale/shift) + sigmoid, gated by stripe mask ----
    attn = jax.nn.sigmoid(norm * bn_scale + bn_shift)            # (1, HW)
    o_ref[0] = jnp.where(mask, attn, 0.0).astype(o_ref.dtype)


def soft_norm(x, *, tau=1.0, p=3.0, eps=EPS,
              bn_weight=1.0, bn_bias=0.0, bn_running_mean=0.0, bn_running_var=1.0):
    """Eval-mode SoftNorm forward. x: (B, C, H, W) -> (B, 1, H, W).

    `tau` only affects the training-mode gumbel mask (not implemented).
    bn_* are BatchNorm2d(1) parameters / running stats (defaults = module init).
    Input may be f32 or bf16; internal math is f32, output matches input dtype.
    """
    del tau  # TODO(synk): used only by the training-mode gumbel_softmax mask.
    B, C, H, W = x.shape
    HW = H * W

    # Fold BatchNorm (eval) into a single scale/shift — no divides inside the kernel.
    bn_scale = float(bn_weight) / math.sqrt(float(bn_running_var) + BN_EPS)
    bn_shift = float(bn_bias) - float(bn_running_mean) * bn_scale

    x2 = x.reshape(B, C, HW)                                     # lane-dense layout
    out = pl.pallas_call(
        functools.partial(_soft_norm_kernel, p=float(p), eps=float(eps),
                          bn_scale=bn_scale, bn_shift=bn_shift, H=H, W=W),
        out_shape=jax.ShapeDtypeStruct((B, 1, HW), x.dtype),
        grid=(B,),
        in_specs=[pl.BlockSpec((1, C, HW), lambda b: (b, 0, 0))],
        out_specs=pl.BlockSpec((1, 1, HW), lambda b: (b, 0, 0)),
        compiler_params=pltpu.CompilerParams(dimension_semantics=("parallel",)),
    )(x2)
    return out.reshape(B, 1, H, W)


# ----------------------------------------------------------------------------
# Pure-JAX reference (mirrors the PyTorch eval forward) for correctness checking
# ----------------------------------------------------------------------------
def soft_norm_ref(x, p=3.0, eps=EPS, bn_weight=1.0, bn_bias=0.0,
                  bn_running_mean=0.0, bn_running_var=1.0):
    B, C, H, W = x.shape
    norm = jnp.maximum(x, eps) ** p
    norm = jnp.sum(norm, axis=1, keepdims=True) ** (1.0 / p)     # (B,1,H,W)
    s = jnp.sum(norm, axis=-1, keepdims=True)                    # (B,1,H,1)
    sp = jnp.pad(s, ((0, 0), (0, 0), (1, 1), (0, 0)))
    sm = sp[:, :, :-2] + sp[:, :, 1:-1] + sp[:, :, 2:]           # conv1d(ones(3), pad=1)
    idx = jnp.argmax(sm[:, 0, :, 0], axis=-1)                    # (B,)
    hio = jnp.arange(H)
    mask = (jnp.abs(hio[None, :] - idx[:, None]) <= K_RADIUS).astype(x.dtype)
    mask = mask[:, None, :, None]                                # broadcast over W
    scale = bn_weight / jnp.sqrt(bn_running_var + BN_EPS)
    shift = bn_bias - bn_running_mean * scale
    return jax.nn.sigmoid(norm * scale + shift) * mask


# ----------------------------------------------------------------------------
if __name__ == "__main__":
    key = jax.random.PRNGKey(0)
    B, C, H, W = 2, 4, 16, 16
    x = jax.random.normal(key, (B, C, H, W), dtype=jnp.float32)

    out = jax.block_until_ready(soft_norm(x))
    assert out.shape == (B, 1, H, W)
    assert bool(jnp.all(jnp.isfinite(out)))

    ref = soft_norm_ref(x)
    err = float(jnp.max(jnp.abs(out - ref)))
    assert err < 1e-4, f"mismatch vs reference: max abs err = {err}"

    print("KERNEL_OK")
</pallas_src>

<mosaic_0001>
module attributes {stable_mosaic.version = 11 : i64} {
  func.func @_soft_norm_kernel(%arg0: i32, %arg1: memref<1x4x256xf32, #tpu.memory_space<vmem>>, %arg2: memref<1x1x256xf32, #tpu.memory_space<vmem>>) attributes {dimension_semantics = [#tpu.dimension_semantics<parallel>], iteration_bounds = array<i64: 2>, scalar_prefetch = 0 : i64, scratch_operands = 0 : i64, tpu.core_type = #tpu.core_type<tc>, window_params = [{transform_indices = @transform_0, window_bounds = array<i64: 1, 4, 256>}, {transform_indices = @transform_1, window_bounds = array<i64: 1, 1, 256>}]} {
    %c0 = arith.constant 0 : index
    %c0_0 = arith.constant 0 : index
    %c0_1 = arith.constant 0 : index
    %0 = vector.load %arg1[%c0, %c0_0, %c0_1] : memref<1x4x256xf32, #tpu.memory_space<vmem>>, vector<1x4x256xf32>
    %1 = vector.shape_cast %0 : vector<1x4x256xf32> to vector<4x256xf32>
    %cst = arith.constant 9.99999997E-7 : f32
    %2 = vector.broadcast %cst : f32 to vector<4x256xf32>
    %3 = arith.maximumf %1, %2 : vector<4x256xf32>
    %4 = arith.mulf %3, %3 : vector<4x256xf32>
    %5 = arith.mulf %4, %3 : vector<4x256xf32>
    %cst_2 = arith.constant dense<0.000000e+00> : vector<256xf32>
    %6 = vector.multi_reduction <add>, %5, %cst_2 [0] : vector<4x256xf32> to vector<256xf32>
    %7 = vector.shape_cast %6 : vector<256xf32> to vector<1x256xf32>
    %cst_3 = arith.constant 0.333333343 : f32
    %8 = vector.broadcast %cst_3 : f32 to vector<1x256xf32>
    %9 = math.powf %7, %8 : vector<1x256xf32>
    %10 = tpu.iota {dimensions = array<i32: 1>} : vector<16x256xi32>
    %11 = tpu.iota {dimensions = array<i32: 0>} : vector<16x256xi32>
    %c1_i32 = arith.constant 1 : i32
    %12 = vector.broadcast %c1_i32 : i32 to vector<16x256xi32>
    %13 = arith.subi %11, %12 : vector<16x256xi32>
    %c16_i32 = arith.constant 16 : i32
    %14 = vector.broadcast %c16_i32 : i32 to vector<16x256xi32>
    %15 = arith.muli %13, %14 : vector<16x256xi32>
    %16 = arith.cmpi sge, %10, %15 : vector<16x256xi32>
    %c1_i32_4 = arith.constant 1 : i32
    %17 = vector.broadcast %c1_i32_4 : i32 to vector<16x256xi32>
    %18 = arith.addi %11, %17 : vector<16x256xi32>
    %c1_i32_5 = arith.constant 1 : i32
    %19 = vector.broadcast %c1_i32_5 : i32 to vector<16x256xi32>
    %20 = arith.addi %18, %19 : vector<16x256xi32>
    %c16_i32_6 = arith.constant 16 : i32
    %21 = vector.broadcast %c16_i32_6 : i32 to vector<16x256xi32>
    %22 = arith.muli %20, %21 : vector<16x256xi32>
    %23 = arith.cmpi slt, %10, %22 : vector<16x256xi32>
    %24 = arith.andi %16, %23 : vector<16x256xi1>
    %cst_7 = arith.constant 0.000000e+00 : f32
    %25 = vector.shape_cast %9 : vector<1x256xf32> to vector<1x256xf32>
    %26 = vector.broadcast %25 : vector<1x256xf32> to vector<16x256xf32>
    %27 = vector.broadcast %cst_7 : f32 to vector<16x256xf32>
    %28 = arith.select %24, %26, %27 : vector<16x256xi1>, vector<16x256xf32>
    %cst_8 = arith.constant dense<0.000000e+00> : vector<16xf32>
    %29 = vector.multi_reduction <add>, %28, %cst_8 [1] : vector<16x256xf32> to vector<16xf32>
    %30 = vector.shape_cast %29 : vector<16xf32> to vector<16x1xf32>
    %31 = vector.shape_cast %30 : vector<16x1xf32> to vector<1x16x1xf32>
    %cst_9 = arith.constant dense<0xFF800000> : vector<1xf32>
    %32 = vector.multi_reduction <maximumf>, %31, %cst_9 [1, 2] : vector<1x16x1xf32> to vector<1xf32>
    %33 = vector.shape_cast %32 : vector<1xf32> to vector<1x1x1xf32>
    %34 = vector.extract %33[0, 0, 0] : f32 from vector<1x1x1xf32>
    %35 = vector.broadcast %34 : f32 to vector<1x1xf32>
    %36 = tpu.iota {dimensions = array<i32: 0>} : vector<16x1xi32>
    %37 = vector.broadcast %35 : vector<1x1xf32> to vector<16x1xf32>
    %38 = arith.cmpf oge, %30, %37 : vector<16x1xf32>
    %c16_i32_10 = arith.constant 16 : i32
    %39 = vector.broadcast %c16_i32_10 : i32 to vector<16x1xi32>
    %40 = arith.select %38, %36, %39 : vector<16x1xi1>, vector<16x1xi32>
    %41 = vector.shape_cast %40 : vector<16x1xi32> to vector<1x16x1xi32>
    %cst_11 = arith.constant dense<2147483647> : vector<1xi32>
    %42 = vector.multi_reduction <minsi>, %41, %cst_11 [1, 2] : vector<1x16x1xi32> to vector<1xi32>
    %43 = vector.shape_cast %42 : vector<1xi32> to vector<1x1x1xi32>
    %44 = vector.extract %43[0, 0, 0] : i32 from vector<1x1x1xi32>
    %45 = vector.broadcast %44 : i32 to vector<1x1xi32>
    %46 = tpu.iota {dimensions = array<i32: 1>} : vector<1x256xi32>
    %c3_i32 = arith.constant 3 : i32
    %47 = vector.broadcast %c3_i32 : i32 to vector<1x1xi32>
    %48 = arith.subi %45, %47 : vector<1x1xi32>
    %c16_i32_12 = arith.constant 16 : i32
    %49 = vector.broadcast %c16_i32_12 : i32 to vector<1x1xi32>
    %50 = arith.muli %48, %49 : vector<1x1xi32>
    %51 = vector.broadcast %50 : vector<1x1xi32> to vector<1x256xi32>
    %52 = arith.cmpi sge, %46, %51 : vector<1x256xi32>
    %c3_i32_13 = arith.constant 3 : i32
    %53 = vector.broadcast %c3_i32_13 : i32 to vector<1x1xi32>
    %54 = arith.addi %45, %53 : vector<1x1xi32>
    %c1_i32_14 = arith.constant 1 : i32
    %55 = vector.broadcast %c1_i32_14 : i32 to vector<1x1xi32>
    %56 = arith.addi %54, %55 : vector<1x1xi32>
    %c16_i32_15 = arith.constant 16 : i32
    %57 = vector.broadcast %c16_i32_15 : i32 to vector<1x1xi32>
    %58 = arith.muli %56, %57 : vector<1x1xi32>
    %59 = vector.broadcast %58 : vector<1x1xi32> to vector<1x256xi32>
    %60 = arith.cmpi slt, %46, %59 : vector<1x256xi32>
    %61 = arith.andi %52, %60 : vector<1x256xi1>
    %cst_16 = arith.constant 0.999994993 : f32
    %62 = vector.broadcast %cst_16 : f32 to vector<1x256xf32>
    %63 = arith.mulf %9, %62 : vector<1x256xf32>
    %cst_17 = arith.constant 0.000000e+00 : f32
    %64 = vector.broadcast %cst_17 : f32 to vector<1x256xf32>
    %65 = arith.addf %63, %64 : vector<1x256xf32>
    %66 = arith.negf %65 : vector<1x256xf32>
    %67 = math.exp %66 : vector<1x256xf32>
    %cst_18 = arith.constant 1.000000e+00 : f32
    %68 = vector.broadcast %cst_18 : f32 to vector<1x256xf32>
    %69 = arith.addf %68, %67 : vector<1x256xf32>
    %70 = arith.divf %68, %69 : vector<1x256xf32>
    %cst_19 = arith.constant 0.000000e+00 : f32
    %71 = vector.broadcast %cst_19 : f32 to vector<1x256xf32>
    %72 = arith.select %61, %70, %71 : vector<1x256xi1>, vector<1x256xf32>
    %c0_20 = arith.constant 0 : index
    %c0_21 = arith.constant 0 : index
    %c0_22 = arith.constant 0 : index
    %73 = vector.load %arg2[%c0_20, %c0_21, %c0_22] : memref<1x1x256xf32, #tpu.memory_space<vmem>>, vector<1x1x256xf32>
    %74 = vector.shape_cast %73 : vector<1x1x256xf32> to vector<1x256xf32>
    %75 = vector.shape_cast %72 : vector<1x256xf32> to vector<1x1x256xf32>
    tpu.vector_store %arg2[%c0_20, %c0_21, %c0_22], %75 {strides = array<i32>} : memref<1x1x256xf32, #tpu.memory_space<vmem>>, vector<1x1x256xf32>,
    return
  }
  func.func @transform_0(%arg0: i32) -> (i32, i32, i32) {
    %c0_i32 = arith.constant 0 : i32
    %c0_i32_0 = arith.constant 0 : i32
    %c0_i32_1 = arith.constant 0 : i32
    return %arg0, %c0_i32, %c0_i32_0 : i32, i32, i32
  }
  func.func @transform_1(%arg0: i32) -> (i32, i32, i32) {
    %c0_i32 = arith.constant 0 : i32
    %c0_i32_0 = arith.constant 0 : i32
    %c0_i32_1 = arith.constant 0 : i32
    return %arg0, %c0_i32, %c0_i32_0 : i32, i32, i32
  }
}

</mosaic_0001>

<bundles_post_ra>
// kernel: tpu_custom_call.1
= control target key start
LH: loop header
LB: loop body
LE: loop exit
PB: predicated region body
PF: predicated region fallthrough
CT: control target
= control target key end

     0   :  { %6 = vsyncpa [#allocation3], 0  ;;  %s860_s0 = inlined_call_operand.hbm [shape: f32[2,4,256], index: 0, kind: input, shape index: {}]   ;;  %s861_s1 = inlined_call_operand.hbm [shape: f32[2,1,256], index: 1, kind: output, shape index: {}]  }
   0x1   :  { %8 = vsyncpa [#allocation3 + $0x1], 0 }
   0x2   :  { %9 = vsyncpa [#allocation4], 0 }
   0x3   :  { %11 = vsyncpa [#allocation4 + $0x1], 0  ;;  %s619_s6 = smov 0   ;;  %s621_s7 = smov 0  }
   0x4   :  { %s623_s8 = smov 0   ;;  %s625_s9 = smov 0  }
   0x5 LB: > { %s640_s10 = sadd.s32 4294967295, %s607_s9   ;;  %s378_s11 = sadd.s32 4294967294, %s607_s9   ;;  %s607_s9 = sphi %s625_s9, %s885_s9   ;;  %s603_s8 = sphi %s623_s8, %s884_s8   ;;  %s599_s7 = sphi %s621_s7, %s883_s7   ;;  %s595_s6 = sphi %s619_s6, %s882_s6  }
   0x6   : > { %s644_s12 = sadd.s32 1, %s607_s9   ;;  %s24_s13 = sadd.s32 1, %s603_s8 }
   0x7   : > { %s21_s14 = ssub.s32 %s607_s9, %s644_s12  ;;  %p31_p0 = scmp.ne.s32.totalorder %s603_s8, %s599_s7 }
   0x8   : > { %p22_p1 = scmp.eq.s32.totalorder %s21_s14, 0  ;;  %p32_p2 = scmp.eq.s32.totalorder %s607_s9, 0 }
   0x9   : > { %p37_p3 = scmp.ne.s32.totalorder %s599_s7, %s595_s6  ;;  %p38_p4 = scmp.eq.s32.totalorder %s640_s10, 0 }
   0xa   : > { %s656_s15 = scalar_select %p22_p1, %s603_s8, %s24_s13  }
   0xb   : > { %p658_p5 = por %p32_p2, %p31_p0  ;;  %p662_p6 = por %p38_p4, %p37_p3 }
   0xc   : > { %p61_p7 = scmp.eq.s32.totalorder %s640_s10, 1  ;;  %p67_p8 = scmp.eq.s32.totalorder %s378_s11, 1 }
   0xd   : > { %p461_p10 = scmp.lt.s32.totalorder %s607_s9, 2  ;;  %s87_s20 = sand.u32 1, %s603_s8  }
   0xe   : > { %p669_p11 = por %p61_p7, %p31_p0  ;;  %p673_p12 = por %p67_p8, %p37_p3 }
   0xf   : > { %s396_s21 = sshll.u32 %s607_s9, 3  ;;  %s381_s22 = sshll.u32 %s87_s20, 3 }
  0x10   : > { %s96_s25 = scalar_lea.hbm %s860_s0, %s396_s21  ;;  %s91_s27 = scalar_lea.vmem [#allocation2], %s381_s22 }
  0x11   : > { %s98_s26 = sshll.u32 %s96_s25, 4  ;;  %s100_s28 = sshll.u32 %s91_s27, 4  ;;  %s99_s26 = int_to_ptr.hbm [resolvable:$true] %s98_s26  ;;  %s101_s28 = int_to_ptr.vmem [resolvable:$true] %s100_s28 }
  0x12   : > { %p684_p13 = pnand %p461_p10, %p658_p5  ;;  %p384_p0 = scmp.ge.s32.totalorder %s607_s9, 1 }
  0x13   : > { %p105_p1 = scmp.lt.s32.totalorder %s607_s9, 3  ;;  %s88_s30 = scalar_lea.sflag [#allocation3], %s87_s20 }
  0x14   : > { %s511_s2 = sshra.s32 %s99_s26, 4  ;;  %p515_p3 = pneg %p684_p13  ;;  %s512_s2 = int_to_ptr.hbm [resolvable:$true] %s511_s2 }
  0x15   : > { %s513_s3 = scalar_lea.hbm %s512_s2, 8  ;;  %s518_s11 = scalar_lea.hbm %s860_s0, 16 }
  0x16   : > { %p514_p2 = scmp.ne.s32.totalorder %s512_s2, %s513_s3  ;;  %p519_p5 = scmp.lt.s32.totalorder %s512_s2, %s860_s0 }
  0x17   : > { %p520_p8 = scmp.lt.s32.totalorder %s518_s11, %s513_s3 }
  0x18   : > { %p516_p4 = pnand %p515_p3, %p514_p2 }
  0x19   : > { %p521_p10 = por %p520_p8, %p519_p5 }
  0x1a   : > { %p517_p7 = pneg %p516_p4 }
  0x1c   : > { %p522_p9 = pnand %p521_p10, %p517_p7 }
  0x1e   : > { %525 = shalt.err (!%p522_p9)
}
  0x1f   : > { %456 = dma.hbm_to_vmem [thread:$0]  (!%p684_p13), %s99_s26, 128, %s101_s28, %s88_s30  }
  0x20   : > { %p106_p2 = pnand %p384_p0, %p105_p1 }
  0x21   : > { %s705_s16 = sand.u32 (!%p106_p2), 1, %s599_s7  }
  0x22   : > { %109 = sbr.rel (%p106_p2) target bundleno = 383 (0x17f), region = 24  ;;  %s385_s20 = sshll.u32 (!%p106_p2), %s705_s16, 3 }
  0x23   : > { %s112_s21 = scalar_lea.sflag (!%p106_p2), [#allocation3], %s705_s16  ;;  %s115_s22 = scalar_lea.vmem (!%p106_p2), [#allocation2], %s385_s20 }
  0x27   : > { %586 = dma.done.wait (%p662_p6), %s112_s21, 128  }
  0x28   : > { %588 = vsyncadd (%p662_p6), %s112_s21, 4294967168  ;;  %v135_v0 = vld [vmem:[%s115_s22] sm:$0xff]  ;;  %vm145_vm0 = vcmask 1043456   ;;  %v162_v26 = vlaneseq  ;;  %s386_s24 = sshll.u32 %s705_s16, 1  ;;  %s393_s25 = sshll.u32 %s640_s10, 1 }
  0x29   : > { %v136_v1 = vmax.f32 %v135_v0, 1e-06  ;;  %s303_s28 = scalar_lea.hbm %s861_s1, %s393_s25  ;;  %s134_s10 = scalar_lea.vmem [#allocation5], %s386_s24 }
  0x2a   : > { %v726_v28 = vshrl.u32 %v162_v26, 7  ;;  %v737_v44 = vand.u32 127, %v162_v26  ;;  %s305_s29 = sshll.u32 %s134_s10, 4  ;;  %s307_s30 = sshll.u32 %s303_s28, 4  ;;  %s306_s29 = int_to_ptr.vmem [resolvable:$true] %s305_s29  ;;  %s308_s30 = int_to_ptr.hbm [resolvable:$true] %s307_s30 }
  0x2b   : > { %v137_v2 = vmul.f32 %v136_v1, %v136_v1  ;;  %s293_s2 = scalar_lea.sflag [#allocation4], %s705_s16  ;;  %s555_s3 = sshra.s32 %s308_s30, 4  ;;  %s556_s3 = int_to_ptr.hbm [resolvable:$true] %s555_s3 }
  0x2c   : > { %v176_v34 = vadd.s32 1, %v726_v28  ;;  %v732_v35 = vadd.s32 8, %v726_v28  ;;  %v387_v39 = vadd.s32 4294967295, %v726_v28  ;;  %v745_v54 = vadd.s32 128, %v737_v44  ;;  %s557_s4 = scalar_lea.hbm %s556_s3, 2  ;;  %s561_s13 = scalar_lea.hbm %s861_s1, 4 }
  0x2d   : > { %v138_v3 = vmul.f32 %v137_v2, %v136_v1  ;;  %p558_p6 = scmp.ne.s32.totalorder %s556_s3, %s557_s4  ;;  %p562_p0 = scmp.lt.s32.totalorder %s556_s3, %s861_s1 }
  0x2e   : > { %v178_v41 = vadd.s32 1, %v176_v34  ;;  %v177_v42 = vadd.s32 1, %v732_v35  ;;  %v170_v47 = vmul.u32 16, %v387_v39  ;;  %v388_v50 = vadd.s32 4294967295, %v732_v35  ;;  %p563_p1 = scmp.lt.s32.totalorder %s561_s13, %s557_s4 }
  0x2f   : > { %140 = vst [vmem:[#allocation1] ss:$2 sm:$0xff] %v138_v3  ;;  %p559_p9 = pnand %p558_p6, %p669_p11 }
  0x30   : > { %v180_v49 = vmul.u32 16, %v178_v41  ;;  %v179_v51 = vadd.s32 1, %v177_v42  ;;  %vm754_vm7 = vcmp.ge.s32.totalorder %v737_v44, %v170_v47  ;;  %v171_v61 = vmul.u32 16, %v388_v50  ;;  %p564_p3 = por %p563_p1, %p562_p0 }
  0x31   : > { %vm766_vm10 = vcmp.ge.s32.totalorder %v745_v54, %v170_v47  ;;  %p560_p13 = pneg %p559_p9 }
  0x32   : > { %vm759_vm8 = vcmp.lt.s32.totalorder %v737_v44, %v180_v49  ;;  %v181_v62 = vmul.u32 16, %v179_v51  ;;  %vm771_vm11 = vcmp.lt.s32.totalorder %v745_v54, %v180_v49 }
  0x33   : > { %vm186_vm15 = vmand %vm754_vm7, %vm759_vm8  ;;  %p565_p4 = pnand %p564_p3, %p560_p13 }
  0x36   : > { %v141_v4 = vld.sshfl [vmem:[#allocation1] sm:$0xff pattern:$0x75316420]  ;;  %v142_v5 = vld.sshfl [vmem:[#allocation1 + $0x8] sm:$0xff pattern:$0x75316420] }
  0x37   : > { %v146_v6 = vsel %vm145_vm0, %v141_v4, 0.0  ;;  %v153_v7 = vsel %vm145_vm0, %v142_v5, 0.0  ;;  %vm187_vm0 = vmand %vm766_vm10, %vm771_vm11 }
  0x38   : > { %v147_v8 = vrot.slane %v146_v6, 4  ;;  %v154_v9 = vrot.slane %v153_v7, 4 }
  0x3a   : > { %v148_v10 = vadd.f32 %v147_v8, %v146_v6  ;;  %v155_v11 = vadd.f32 %v154_v9, %v153_v7 }
  0x3c   : > { %v149_v12 = vrot.slane %v148_v10, 2  ;;  %v156_v13 = vrot.slane %v155_v11, 2 }
  0x3e   : > { %v150_v14 = vadd.f32 %v149_v12, %v148_v10  ;;  %v157_v15 = vadd.f32 %v156_v13, %v155_v11 }
  0x40   : > { %v151_v16 = vrot.slane %v150_v14, 1  ;;  %v158_v17 = vrot.slane %v157_v15, 1 }
  0x42   : > { %v713_v18 = vadd.f32 %v151_v16, %v150_v14  ;;  %v715_v19 = vadd.f32 %v158_v17, %v157_v15 }
  0x44   : > { %v718_v20 = vand.u32 2147483647, %v713_v18  ;;  %v721_v21 = vand.u32 2147483647, %v715_v19  ;;  %vm397_vm1 = vcmp.eq.f32.partialorder %v713_v18, 0.0  ;;  %vm398_vm2 = vcmp.lt.f32.partialorder %v713_v18, 0.0 }
  0x45   : > { %v416_v53 = vand.u32 2147483648, %v713_v18  ;;  %v440_v57 = vand.u32 2147483648, %v715_v19  ;;  %vm422_vm9 = vcmp.lt.f32.partialorder %v715_v19, 0.0  ;;  %vm421_vm13 = vcmp.eq.f32.partialorder %v715_v19, 0.0 }
  0x46   : > { %495 = vlog2.f32 %v718_v20  ;;  %vm413_vm3 = vweird.f32 %v718_v20  ;;  %vm415_vm4 = vcmp.eq.f32.partialorder %v718_v20, 0.0  ;;  %vm437_vm5 = vweird.f32 %v721_v21 }
  0x47   : > { %497 = vlog2.f32 %v721_v21  ;;  %vm439_vm6 = vcmp.eq.f32.partialorder %v721_v21, 0.0  ;;  %vm400_vm12 = vcmp.eq.f32.partialorder %v718_v20, inf  ;;  %vm424_vm14 = vcmp.eq.f32.partialorder %v721_v21, inf }
  0x4c   : > { %v496_v22 = vpop.eup %495 }
  0x4d   : > { %v498_v23 = vpop.eup %497  ;;  %v403_v24 = vmul.f32 -0.33333334, %v496_v22 }
  0x4e   : > { %v427_v25 = vmul.f32 -0.33333334, %v498_v23 }
  0x4f   : > { %499 = vpow2.f32 %v403_v24 }
  0x50   : > { %501 = vpow2.f32 %v427_v25 }
  0x55   : > { %v500_v27 = vpop.eup %499 }
  0x56   : > { %v502_v29 = vpop.eup %501  ;;  %v405_v30 = vmul.f32 %v500_v27, %v500_v27 }
  0x57   : > { %v429_v31 = vmul.f32 %v502_v29, %v502_v29 }
  0x58   : > { %v406_v32 = vmul.f32 %v405_v30, %v718_v20 }
  0x59   : > { %v430_v33 = vmul.f32 %v429_v31, %v721_v21 }
  0x5a   : > { %v407_v36 = vmul.f32 %v406_v32, %v405_v30 }
  0x5b   : > { %v431_v37 = vmul.f32 %v430_v33, %v429_v31 }
  0x5c   : > { %v408_v38 = vsub.f32 %v407_v36, %v500_v27 }
  0x5d   : > { %v432_v40 = vsub.f32 %v431_v37, %v502_v29 }
  0x5e   : > { %v409_v43 = vmul.f32 -0.33333334, %v408_v38 }
  0x5f   : > { %v433_v45 = vmul.f32 -0.33333334, %v432_v40 }
  0x60   : > { %v410_v46 = vadd.f32 %v500_v27, %v409_v43 }
  0x61   : > { %v434_v48 = vadd.f32 %v502_v29, %v433_v45 }
  0x62   : > { %v411_v52 = vmul.f32 %v410_v46, %v713_v18 }
  0x63   : > { %v435_v55 = vmul.f32 %v434_v48, %v715_v19 }
  0x64   : > { %v412_v56 = vmul.f32 %v411_v52, %v410_v46 }
  0x65   : > { %v436_v59 = vmul.f32 %v435_v55, %v434_v48 }
  0x66   : > { %v414_v63 = vsel %vm413_vm3, %v713_v18, %v412_v56  ;;  %vm184_vm3 = vcmp.lt.s32.totalorder %v737_v44, %v181_v62 }
  0x67   : > { %v417_v2 = vsel %vm415_vm4, %v416_v53, %v414_v63  ;;  %v438_v3 = vsel %vm437_vm5, %v715_v19, %v436_v59  ;;  %vm175_vm4 = vcmp.ge.s32.totalorder %v745_v54, %v171_v61  ;;  %vm185_vm5 = vcmp.lt.s32.totalorder %v745_v54, %v181_v62 }
  0x68   : > { %v418_v4 = vsel %vm398_vm2, nan, %v417_v2  ;;  %v441_v5 = vsel %vm439_vm6, %v440_v57, %v438_v3  ;;  %vm174_vm2 = vcmp.ge.s32.totalorder %v737_v44, %v171_v61  ;;  %vm189_vm6 = vmand %vm175_vm4, %vm185_vm5 }
  0x69   : > { %v419_v6 = vsel %vm397_vm1, 0.0, %v418_v4  ;;  %v442_v7 = vsel %vm422_vm9, nan, %v441_v5  ;;  %vm188_vm1 = vmand %vm174_vm2, %vm184_vm3 }
  0x6a   : > { %v420_v8 = vsel %vm400_vm12, inf, %v419_v6  ;;  %v443_v9 = vsel %vm421_vm13, 0.0, %v442_v7 }
  0x6b   : > { %v444_v10 = vsel %vm424_vm14, inf, %v443_v9  ;;  %v190_v11 = vsel %vm186_vm15, %v420_v8, 0.0  ;;  %v192_v14 = vsel %vm188_vm1, %v420_v8, 0.0  ;;  %v390_v40 = vmul.f32 -0.999995, %v420_v8 }
  0x6c   : > { %v191_v12 = vsel %vm187_vm0, %v444_v10, 0.0  ;;  %v193_v15 = vsel %vm189_vm6, %v444_v10, 0.0  ;;  %v391_v39 = vmul.f32 -0.999995, %v444_v10 }
  0x6d   : > { %v194_v13 = vadd.f32 %v191_v12, %v190_v11  ;;  %v197_v16 = vadd.f32 %v193_v15, %v192_v14  ;;  %v243_v42 = vmul.f32 1.442695, %v390_v40 }
  0x6e   : > { %v245_v41 = vmul.f32 1.442695, %v391_v39 }
  0x6f   : > { %195 = vadd.xlane.f32.xlu0 %v194_v13 }
  0x70   : > { %503 = vpow2.f32 %v245_v41 }
  0x71   : > { %505 = vpow2.f32 %v243_v42 }
  0x77   : > { %198 = vadd.xlane.f32.xlu0 %v197_v16 }
  0xe2   : > { %v196_v17 = vpop.xlane.xlu0 %195 }
  0xea   : > { %v199_v18 = vpop.xlane.xlu0 %198 }
  0xeb   : > { %v200_v19 = vmax.f32 %v196_v17, %v199_v18 }
  0xed   : > { %v201_v20 = vrot.slane %v200_v19, 4 }
  0xef   : > { %v202_v21 = vmax.f32 %v200_v19, %v201_v20 }
  0xf1   : > { %v203_v22 = vrot.slane %v202_v21, 2 }
  0xf3   : > { %v204_v23 = vmax.f32 %v202_v21, %v203_v22 }
  0xf5   : > { %v205_v24 = vrot.slane %v204_v23, 1 }
  0xf7   : > { %v206_v25 = vmax.f32 %v204_v23, %v205_v24 }
  0xf9   : > { %445 = vpush %v206_v25 }
 0x12a   : > { %s446_s17 = spop %445 }
 0x12b   : > { %v208_v27 = vstv %s446_s17 }
 0x12c   : > { %vm209_vm7 = vcmp.ge.f32.partialorder %v196_v17, %v208_v27  ;;  %vm210_vm8 = vcmp.ge.f32.partialorder %v199_v18, %v208_v27 }
 0x12d   : > { %v211_v29 = vsel %vm209_vm7, %v726_v28, 16  ;;  %v212_v30 = vsel %vm210_vm8, %v732_v35, 16  ;;  %v504_v28 = vpop.eup %503 }
 0x12e   : > { %vm213_vm9 = vcmp.lt.s32.totalorder %v211_v29, %v212_v30  ;;  %v506_v35 = vpop.eup %505  ;;  %v248_v43 = vadd.f32 1.0, %v504_v28 }
 0x12f   : > { %v214_v31 = vsel %vm213_vm9, %v211_v29, %v212_v30  ;;  %v247_v45 = vadd.f32 1.0, %v506_v35 }
 0x130   : > { %v215_v32 = vrot.slane %v214_v31, 4  ;;  %507 = vrcp.f32 %v248_v43  ;;  %vm269_vm13 = vweird.f32 %v248_v43  ;;  %v275_v55 = vand.u32 2147483648, %v248_v43 }
 0x131   : > { %509 = vrcp.f32 %v247_v45  ;;  %vm254_vm15 = vweird.f32 %v247_v45  ;;  %v273_v58 = vand.u32 2147483647, %v248_v43  ;;  %v260_v61 = vand.u32 2147483648, %v247_v45 }
 0x132   : > { %vm216_vm10 = vcmp.lt.s32.totalorder %v214_v31, %v215_v32  ;;  %v258_v0 = vand.u32 2147483647, %v247_v45  ;;  %v276_v4 = vor.u32 1.1754944e-38, %v275_v55 }
 0x133   : > { %v217_v33 = vsel %vm216_vm10, %v214_v31, %v215_v32  ;;  %vm274_vm4 = vcmp.eq.f32.partialorder %v273_v58, 8.507059e+37  ;;  %v261_v7 = vor.u32 1.1754944e-38, %v260_v61 }
 0x134   : > { %v218_v34 = vrot.slane %v217_v33, 2  ;;  %vm259_vm5 = vcmp.eq.f32.partialorder %v258_v0, 8.507059e+37 }
 0x136   : > { %vm219_vm11 = vcmp.lt.s32.totalorder %v217_v33, %v218_v34  ;;  %v508_v46 = vpop.eup %507 }
 0x137   : > { %v220_v36 = vsel %vm219_vm11, %v217_v33, %v218_v34  ;;  %v510_v47 = vpop.eup %509  ;;  %v265_v48 = vmul.f32 %v508_v46, %v248_v43  ;;  %vm270_vm14 = vweird.f32 %v508_v46  ;;  %vm284_vm11 = vcmask 1040384  }
 0x138   : > { %v221_v37 = vrot.slane %v220_v36, 1  ;;  %v250_v49 = vmul.f32 %v510_v47, %v247_v45  ;;  %vm255_vm0 = vweird.f32 %v510_v47  ;;  %vm803_vm2 = vmor %vm269_vm13, %vm270_vm14 }
 0x139   : > { %v266_v50 = vsub.f32 1.0, %v265_v48  ;;  %vm807_vm3 = vmor %vm254_vm15, %vm255_vm0 }
 0x13a   : > { %vm222_vm12 = vcmp.lt.s32.totalorder %v220_v36, %v221_v37  ;;  %v251_v51 = vsub.f32 1.0, %v250_v49 }
 0x13b   : > { %v223_v38 = vsel %vm222_vm12, %v220_v36, %v221_v37  ;;  %v267_v52 = vmul.f32 %v508_v46, %v266_v50  ;;  %vm289_vm12 = vcmp.lt.s32.totalorder %v162_v26, 256 }
 0x13c   : > { %447 = vpush %v223_v38  ;;  %v252_v53 = vmul.f32 %v510_v47, %v251_v51 }
 0x13d   : > { %v268_v57 = vadd.f32 %v508_v46, %v267_v52 }
 0x13e   : > { %v253_v63 = vadd.f32 %v510_v47, %v252_v53 }
 0x13f   : > { %v272_v5 = vsel %vm803_vm2, %v508_v46, %v268_v57 }
 0x140   : > { %v257_v8 = vsel %vm807_vm3, %v510_v47, %v253_v63  ;;  %v277_v10 = vsel %vm274_vm4, %v276_v4, %v272_v5 }
 0x141   : > { %v262_v11 = vsel %vm259_vm5, %v261_v7, %v257_v8 }
 0x16d   : > { %s448_s23 = spop %447 }
 0x16e   : > { %v225_v56 = vstv %s448_s23 }
 0x16f   : > { %v389_v59 = vadd.s32 4294967293, %v225_v56  ;;  %v230_v60 = vadd.s32 3, %v225_v56 }
 0x171   : > { %v227_v1 = vmul.u32 16, %v389_v59  ;;  %v231_v2 = vadd.s32 1, %v230_v60 }
 0x173   : > { %v232_v6 = vmul.u32 16, %v231_v2  ;;  %vm821_vm1 = vcmp.ge.s32.totalorder %v737_v44, %v227_v1  ;;  %vm229_vm8 = vcmp.ge.s32.totalorder %v745_v54, %v227_v1 }
 0x175   : > { %vm233_vm6 = vcmp.lt.s32.totalorder %v737_v44, %v232_v6  ;;  %vm234_vm7 = vcmp.lt.s32.totalorder %v745_v54, %v232_v6 }
 0x176   : > { %vm235_vm9 = vmand %vm821_vm1, %vm233_vm6 }
 0x177   : > { %vm236_vm10 = vmand %vm229_vm8, %vm234_vm7  ;;  %v279_v44 = vsel %vm235_vm9, %v262_v11, 0.0 }
 0x178   : > { %v280_v12 = vsel %vm236_vm10, %v277_v10, 0.0 }
 0x179   : > { %v283_v13 = vrot.slane %v280_v12, 7 }
 0x17b   : > { %v285_v14 = vsel %vm284_vm11, %v279_v44, %v283_v13 }
 0x17c   : > { %291 = vst.msk [vmem:[%s134_s10] sm:$0x3] %vm289_vm12, %v285_v14 }
 0x17d   : > { %568 = shalt.err (!%p565_p4)
}
 0x17e   : > { %451 = dma.vmem_to_hbm [thread:$0]  (%p669_p11), %s306_s29, 32, %s308_s30, %s293_s2  }
 0x17f PF: > { %s319_s16 = sand.u32 1, %s595_s6   ;;  %p881_p7 = scmp.ge.s32.totalorder %s607_s9, 2 }
 0x180   : > { %s320_s21 = scalar_lea.sflag [#allocation4], %s319_s16 }
 0x181   : > { %p458_p5 = pnand %p881_p7, %p673_p12 }
 0x183   : > { %p459_p8 = pneg %p458_p5 }
 0x185   : > { %590 = dma.done.wait (%p459_p8), %s320_s21, 32  }
 0x186   : > { %592 = vsyncadd (%p459_p8), %s320_s21, 4294967264  ;;  %p14_p10 = scmp.ge.s32.totalorder %s644_s12, 4   ;;  %s882_s6 = smov %s599_s7 }
 0x187   : > { %s883_s7 = smov %s603_s8  ;;  %s884_s8 = smov %s656_s15 }
 0x188   : > { %s885_s9 = smov %s644_s12  ;;  %16 = sbr.rel (!%p14_p10) target bundleno = 5 (0x5), region = 69 }
 0x18d   :  { %326 = vsyncpa [#allocation3], 1 }
 0x18e   :  { %328 = vsyncpa [#allocation3 + $0x1], 1 }
 0x18f   :  { %329 = vsyncpa [#allocation4], 1 }
 0x190   :  { %331 = vsyncpa [#allocation4 + $0x1], 1 }

</bundles_post_ra>
